<compile_context>
chip_gen: v5e
topology: v5e:2x2
jax: 0.10.0
libtpu: 0.0.40
codegen_flags: <defaults>
</compile_context>

<pallas_src>
import functools

import jax
import jax.numpy as jnp
from jax.experimental import pallas as pl
from jax.experimental.pallas import tpu as pltpu


def _nonlocal_kernel(x_ref, xp_ref, wt_ref, bt_ref, wpg_ref, bpg_ref, o_ref,
                     *, dim_inner, compute_dtype):
    cd = compute_dtype
    x = x_ref[...].astype(cd)        # (tq,  C)   query tile, channels-last
    xp = xp_ref[...].astype(cd)      # (HWp, C)   all pooled tokens

    # theta (scale folded, zero-padded to cf columns) and the fused
    # [phi | g@w_out] projection of the pooled tokens: one MXU push each.
    theta = jnp.dot(x, wt_ref[...].astype(cd),
                    preferred_element_type=jnp.float32) + bt_ref[...]     # (tq, cf)
    pg = jnp.dot(xp, wpg_ref[...].astype(cd),
                 preferred_element_type=jnp.float32) + bpg_ref[...]       # (HWp, cf)

    # Scores: theta's zero-padded columns null out the g'/padding part of pg,
    # so this is exactly (theta * Ci^-0.5) @ phi^T.  (NT matmul on the MXU.)
    s = jax.lax.dot_general(theta.astype(cd), pg.astype(cd),
                            (((1,), (1,)), ((), ())),
                            preferred_element_type=jnp.float32)           # (tq, HWp)

    # Numerically stable softmax numerator; normalization deferred below.
    s = s - jnp.max(s, axis=-1, keepdims=True)
    e = jnp.exp(s)
    # Exact reciprocal keeps bit-level parity with the f32 reference;
    # approx=True (EUP vrcp) is a valid cheaper choice if tolerance allows.
    inv = pl.reciprocal(jnp.sum(e, axis=-1, keepdims=True))               # (tq, 1)

    # Unnormalized aggregation: columns [Ci : Ci+Co] are e @ (g @ w_out + b).
    tf = jnp.dot(e.astype(cd), pg.astype(cd),
                 preferred_element_type=jnp.float32)                      # (tq, cf)

    # Normalize the small result, transpose to lane-dense (cf, tq) and take
    # the output rows (sublane slice -> cheap, always aligned to cf = 128k).
    y_t = (tf * inv).T                                                    # (cf, tq)
    co = o_ref.shape[0]
    o_ref[...] = y_t[dim_inner:dim_inner + co, :].astype(o_ref.dtype)     # (Co, tq)


def _choose_block_q(hw, block_q):
    """Largest 128-aligned query tile <= block_q that divides hw (else hw)."""
    if hw <= block_q or hw % 128 != 0:
        return hw
    tq = (min(block_q, hw) // 128) * 128
    while tq >= 128:
        if hw % tq == 0:
            return tq
        tq -= 128
    return hw


def nonlocal_attention_pallas(x_flat, xp_flat, params, dim_inner, *,
                              block_q=128, compute_dtype=jnp.float32):
    """Fused attention + folded out-conv. Returns pre-BN output (B, Co, HW)."""
    B, HW, C = x_flat.shape
    _, HWp, _ = xp_flat.shape
    Ci = dim_inner
    Co = params["w_out"].shape[1]
    scale = float(Ci) ** (-0.5)
    f32 = jnp.float32

    # ---- Algebraic weight folds, done once outside the hot loop ----------
    w_g_out = jnp.dot(params["w_g"].astype(f32), params["w_out"].astype(f32))      # (C, Co)
    b_g_out = (jnp.dot(params["b_g"].astype(f32), params["w_out"].astype(f32))
               + params["b_out"].astype(f32))                                      # (1, Co)

    # Fused xp-side projection [phi | g@w_out], zero-padded to a 128-multiple
    # width so every intermediate is lane-aligned (transpose / slices stay on
    # clean (8,128) boundaries).  theta gets zero columns in the same slots.
    cf = ((Ci + Co + 127) // 128) * 128
    pad = cf - (Ci + Co)
    w_pg = jnp.concatenate([params["w_phi"].astype(f32), w_g_out,
                            jnp.zeros((C, pad), f32)], axis=1)                     # (C, cf)
    b_pg = jnp.concatenate([params["b_phi"].astype(f32), b_g_out,
                            jnp.zeros((1, pad), f32)], axis=1)                     # (1, cf)
    w_th = jnp.concatenate([params["w_theta"].astype(f32) * scale,
                            jnp.zeros((C, Co + pad), f32)], axis=1)                # (C, cf)
    b_th = jnp.concatenate([params["b_theta"].astype(f32) * scale,
                            jnp.zeros((1, Co + pad), f32)], axis=1)                # (1, cf)

    tq = _choose_block_q(HW, block_q)
    nq = HW // tq

    kernel = functools.partial(_nonlocal_kernel, dim_inner=Ci,
                               compute_dtype=compute_dtype)
    const2d = lambda shape: pl.BlockSpec(shape, lambda b, q: (0, 0))

    return pl.pallas_call(
        kernel,
        out_shape=jax.ShapeDtypeStruct((B, Co, HW), jnp.float32),
        grid_spec=pltpu.PrefetchScalarGridSpec(
            num_scalar_prefetch=0,
            grid=(B, nq),
            in_specs=[
                # batch dim squeezed out of the kernel refs
                pl.BlockSpec((None, tq, C), lambda b, q: (b, q, 0)),    # x query tile
                pl.BlockSpec((None, HWp, C), lambda b, q: (b, 0, 0)),   # all pooled tokens
                const2d((C, cf)), const2d((1, cf)),                     # theta weight / bias
                const2d((C, cf)), const2d((1, cf)),                     # fused [phi|g'] weight / bias
            ],
            out_specs=pl.BlockSpec((None, Co, tq), lambda b, q: (b, 0, q)),
        ),
        compiler_params=pltpu.CompilerParams(
            # batch and query-tile blocks are independent -> both parallel
            # (lets v7x spread work across both TensorCores).
            dimension_semantics=("parallel", "parallel"),
            # TODO(synk): at production H/W, raise vmem_limit_bytes on
            # v5e/v6e (128 MiB physical) and keep block_q modest on v7x
            # (64 MiB VMEM); cast activations/weights to bf16 for the MXU
            # via compute_dtype=jnp.bfloat16 on v6e/v7x.
        ),
    )(x_flat, xp_flat, w_th, b_th, w_pg, b_pg)


def nonlocal_embedded_gaussian_forward(x, params, dim_inner, max_pool_stride=2,
                                       *, block_q=128, compute_dtype=jnp.float32):
    """Full forward pass. x is NCHW (PyTorch convention)."""
    B, C, H, W = x.shape
    s = max_pool_stride
    Hp, Wp = H // s, W // s

    # MaxPool2d(kernel=stride, no padding) via reshape-max.
    pool = x.reshape(B, C, Hp, s, Wp, s).max(axis=(3, 5))

    # Channels-last token views for the kernel.
    x_flat = x.transpose(0, 2, 3, 1).reshape(B, H * W, C)
    xp_flat = pool.transpose(0, 2, 3, 1).reshape(B, Hp * Wp, C)

    # Fused attention + (folded) output conv in Pallas. Output is already
    # channels-first (B, Co, HW), so no post-kernel transpose is needed.
    y_pre = nonlocal_attention_pallas(x_flat, xp_flat, params, dim_inner,
                                      block_q=block_q,
                                      compute_dtype=compute_dtype)

    # BatchNorm2d in training mode with fresh-module defaults: batch stats,
    # gamma=1, beta=0, eps=1e-5, biased variance. Needs a cross-batch
    # reduction, so it stays outside the per-(batch, q-tile) kernel.
    eps = 1e-5
    mean = jnp.mean(y_pre, axis=(0, 2), keepdims=True)
    var = jnp.mean((y_pre - mean) ** 2, axis=(0, 2), keepdims=True)
    y_bn = (y_pre - mean) * jax.lax.rsqrt(var + eps)

    # Residual (requires dim_out == dim_in, as in the PyTorch module).
    return y_bn.reshape(B, -1, H, W) + x


def _reference_forward(x, params, dim_inner, max_pool_stride=2):
    """Pure-JAX reference mirroring the PyTorch forward exactly (unfolded)."""
    B, C, H, W = x.shape
    s = max_pool_stride
    Hp, Wp = H // s, W // s
    Ci = dim_inner

    def conv1x1(inp_nchw, w_ci_co, b_co):
        return jnp.einsum('bchw,cd->bdhw', inp_nchw, w_ci_co) + b_co[0][None, :, None, None]

    theta_x = conv1x1(x, params["w_theta"], params["b_theta"]).reshape(B, Ci, -1)
    theta_x = theta_x.transpose(0, 2, 1)                       # (B, HW, Ci)
    pool_x = x.reshape(B, C, Hp, s, Wp, s).max(axis=(3, 5))
    phi_x = conv1x1(pool_x, params["w_phi"], params["b_phi"]).reshape(B, Ci, -1)
    g_x = conv1x1(pool_x, params["w_g"], params["b_g"]).reshape(B, Ci, -1)
    theta_phi = jnp.einsum('bqc,bck->bqk', theta_x, phi_x) * Ci ** (-0.5)
    p_x = jax.nn.softmax(theta_phi, axis=-1)
    p_x = p_x.transpose(0, 2, 1)                               # (B, HWp, HW)
    t_x = jnp.einsum('bck,bkq->bcq', g_x, p_x).reshape(B, Ci, H, W)
    y = conv1x1(t_x, params["w_out"], params["b_out"])
    eps = 1e-5
    mean = jnp.mean(y, axis=(0, 2, 3), keepdims=True)
    var = jnp.mean((y - mean) ** 2, axis=(0, 2, 3), keepdims=True)
    y = (y - mean) / jnp.sqrt(var + eps)
    return y + x


def init_params(key, dim_in, dim_inner, dim_out):
    # Conv weights ~ N(0, 0.01), biases = 0 (matches _init_modules).
    k1, k2, k3, k4 = jax.random.split(key, 4)
    std = 0.01
    return {
        "w_theta": jax.random.normal(k1, (dim_in, dim_inner), jnp.float32) * std,
        "b_theta": jnp.zeros((1, dim_inner), jnp.float32),
        "w_phi": jax.random.normal(k2, (dim_in, dim_inner), jnp.float32) * std,
        "b_phi": jnp.zeros((1, dim_inner), jnp.float32),
        "w_g": jax.random.normal(k3, (dim_in, dim_inner), jnp.float32) * std,
        "b_g": jnp.zeros((1, dim_inner), jnp.float32),
        "w_out": jax.random.normal(k4, (dim_inner, dim_out), jnp.float32) * std,
        "b_out": jnp.zeros((1, dim_out), jnp.float32),
    }


if __name__ == "__main__":
    key = jax.random.PRNGKey(0)
    kx, kp = jax.random.split(key)

    B, C, H, W = 2, 16, 16, 16          # dim_in = dim_out = 16 (needed for the residual)
    dim_inner = 8

    x = jax.random.normal(kx, (B, C, H, W), jnp.float32)
    params = init_params(kp, C, dim_inner, C)

    fwd = jax.jit(functools.partial(nonlocal_embedded_gaussian_forward,
                                    dim_inner=dim_inner))
    out = fwd(x, params)
    out = jax.block_until_ready(out)

    ref = _reference_forward(x, params, dim_inner)
    assert out.shape == (B, C, H, W)
    # BatchNorm divides by the tiny (~1e-4) batch std of the pre-BN signal,
    # which amplifies f32 reassociation noise from the algebraic weight folds;
    # 1e-3 is still a strict check on the O(1) normalized + residual output.
    max_diff = float(jnp.max(jnp.abs(out - ref)))
    assert jnp.allclose(out, ref, atol=1e-3, rtol=1e-3), (
        f"mismatch vs reference: max abs diff = {max_diff}")

    print("KERNEL_OK")
</pallas_src>

<mosaic_0001>
module attributes {stable_mosaic.version = 11 : i64} {
  func.func @_nonlocal_kernel(%arg0: i32, %arg1: i32, %arg2: memref<1x128x16xf32, #tpu.memory_space<vmem>>, %arg3: memref<1x64x16xf32, #tpu.memory_space<vmem>>, %arg4: memref<16x128xf32, #tpu.memory_space<vmem>>, %arg5: memref<1x128xf32, #tpu.memory_space<vmem>>, %arg6: memref<16x128xf32, #tpu.memory_space<vmem>>, %arg7: memref<1x128xf32, #tpu.memory_space<vmem>>, %arg8: memref<1x16x128xf32, #tpu.memory_space<vmem>>) attributes {dimension_semantics = [#tpu.dimension_semantics<parallel>, #tpu.dimension_semantics<parallel>], iteration_bounds = array<i64: 2, 2>, scalar_prefetch = 0 : i64, scratch_operands = 0 : i64, tpu.core_type = #tpu.core_type<tc>, window_params = [{transform_indices = @transform_0, window_bounds = array<i64: 1, 128, 16>}, {transform_indices = @transform_1, window_bounds = array<i64: 1, 64, 16>}, {pipeline_mode = #tpu.pipeline_mode<synchronous>, transform_indices = @transform_2, window_bounds = array<i64: 16, 128>}, {pipeline_mode = #tpu.pipeline_mode<synchronous>, transform_indices = @transform_3, window_bounds = array<i64: 1, 128>}, {pipeline_mode = #tpu.pipeline_mode<synchronous>, transform_indices = @transform_4, window_bounds = array<i64: 16, 128>}, {pipeline_mode = #tpu.pipeline_mode<synchronous>, transform_indices = @transform_5, window_bounds = array<i64: 1, 128>}, {transform_indices = @transform_6, window_bounds = array<i64: 1, 16, 128>}]} {
    %c0 = arith.constant 0 : index
    %c0_0 = arith.constant 0 : index
    %c0_1 = arith.constant 0 : index
    %0 = vector.load %arg2[%c0, %c0_0, %c0_1] : memref<1x128x16xf32, #tpu.memory_space<vmem>>, vector<1x128x16xf32>
    %1 = vector.shape_cast %0 : vector<1x128x16xf32> to vector<128x16xf32>
    %c0_2 = arith.constant 0 : index
    %c0_3 = arith.constant 0 : index
    %c0_4 = arith.constant 0 : index
    %2 = vector.load %arg3[%c0_2, %c0_3, %c0_4] : memref<1x64x16xf32, #tpu.memory_space<vmem>>, vector<1x64x16xf32>
    %3 = vector.shape_cast %2 : vector<1x64x16xf32> to vector<64x16xf32>
    %c0_5 = arith.constant 0 : index
    %c0_6 = arith.constant 0 : index
    %4 = vector.load %arg4[%c0_5, %c0_6] : memref<16x128xf32, #tpu.memory_space<vmem>>, vector<16x128xf32>
    %cst = arith.constant dense<0.000000e+00> : vector<128x128xf32>
    %5 = tpu.matmul %1, %4, %cst {dimension_numbers = #tpu.dot_dimension_numbers<[1], [0], [0], [1], [0, 0, 1, 1], [], []>} : vector<128x16xf32>, vector<16x128xf32>, vector<128x128xf32> -> vector<128x128xf32>
    %c0_7 = arith.constant 0 : index
    %c0_8 = arith.constant 0 : index
    %6 = vector.load %arg5[%c0_7, %c0_8] : memref<1x128xf32, #tpu.memory_space<vmem>>, vector<1x128xf32>
    %7 = vector.broadcast %6 : vector<1x128xf32> to vector<128x128xf32>
    %8 = arith.addf %5, %7 : vector<128x128xf32>
    %c0_9 = arith.constant 0 : index
    %c0_10 = arith.constant 0 : index
    %9 = vector.load %arg6[%c0_9, %c0_10] : memref<16x128xf32, #tpu.memory_space<vmem>>, vector<16x128xf32>
    %cst_11 = arith.constant dense<0.000000e+00> : vector<64x128xf32>
    %10 = tpu.matmul %3, %9, %cst_11 {dimension_numbers = #tpu.dot_dimension_numbers<[1], [0], [0], [1], [0, 0, 1, 1], [], []>} : vector<64x16xf32>, vector<16x128xf32>, vector<64x128xf32> -> vector<64x128xf32>
    %c0_12 = arith.constant 0 : index
    %c0_13 = arith.constant 0 : index
    %11 = vector.load %arg7[%c0_12, %c0_13] : memref<1x128xf32, #tpu.memory_space<vmem>>, vector<1x128xf32>
    %12 = vector.broadcast %11 : vector<1x128xf32> to vector<64x128xf32>
    %13 = arith.addf %10, %12 : vector<64x128xf32>
    %cst_14 = arith.constant dense<0.000000e+00> : vector<128x64xf32>
    %14 = tpu.matmul %8, %13, %cst_14 {dimension_numbers = #tpu.dot_dimension_numbers<[1], [1], [0], [0], [0, 0, 1, 0], [], []>} : vector<128x128xf32>, vector<64x128xf32>, vector<128x64xf32> -> vector<128x64xf32>
    %cst_15 = arith.constant dense<0xFF800000> : vector<128xf32>
    %15 = vector.multi_reduction <maximumf>, %14, %cst_15 [1] : vector<128x64xf32> to vector<128xf32>
    %16 = vector.shape_cast %15 : vector<128xf32> to vector<128x1xf32>
    %17 = vector.broadcast %16 : vector<128x1xf32> to vector<128x64xf32>
    %18 = arith.subf %14, %17 : vector<128x64xf32>
    %19 = math.exp %18 : vector<128x64xf32>
    %cst_16 = arith.constant dense<0.000000e+00> : vector<128xf32>
    %20 = vector.multi_reduction <add>, %19, %cst_16 [1] : vector<128x64xf32> to vector<128xf32>
    %21 = vector.shape_cast %20 : vector<128xf32> to vector<128x1xf32>
    %22 = tpu.reciprocal %21 : vector<128x1xf32> -> vector<128x1xf32>
    %cst_17 = arith.constant dense<0.000000e+00> : vector<128x128xf32>
    %23 = tpu.matmul %19, %13, %cst_17 {dimension_numbers = #tpu.dot_dimension_numbers<[1], [0], [0], [1], [0, 0, 1, 1], [], []>} : vector<128x64xf32>, vector<64x128xf32>, vector<128x128xf32> -> vector<128x128xf32>
    %24 = vector.broadcast %22 : vector<128x1xf32> to vector<128x128xf32>
    %25 = arith.mulf %23, %24 : vector<128x128xf32>
    %26 = tpu.transpose %25, [1, 0] : vector<128x128xf32> -> vector<128x128xf32>
    %27 = vector.extract_strided_slice %26 {offsets = [8, 0], sizes = [16, 128], strides = [1, 1]} : vector<128x128xf32> to vector<16x128xf32>
    %c0_18 = arith.constant 0 : index
    %c0_19 = arith.constant 0 : index
    %c0_20 = arith.constant 0 : index
    %28 = vector.load %arg8[%c0_18, %c0_19, %c0_20] : memref<1x16x128xf32, #tpu.memory_space<vmem>>, vector<1x16x128xf32>
    %29 = vector.shape_cast %28 : vector<1x16x128xf32> to vector<16x128xf32>
    %30 = vector.shape_cast %27 : vector<16x128xf32> to vector<1x16x128xf32>
    tpu.vector_store %arg8[%c0_18, %c0_19, %c0_20], %30 {strides = array<i32>} : memref<1x16x128xf32, #tpu.memory_space<vmem>>, vector<1x16x128xf32>,
    return
  }
  func.func @transform_0(%arg0: i32, %arg1: i32) -> (i32, i32, i32) {
    %c0_i32 = arith.constant 0 : i32
    %c0_i32_0 = arith.constant 0 : i32
    return %arg0, %arg1, %c0_i32 : i32, i32, i32
  }
  func.func @transform_1(%arg0: i32, %arg1: i32) -> (i32, i32, i32) {
    %c0_i32 = arith.constant 0 : i32
    %c0_i32_0 = arith.constant 0 : i32
    %c0_i32_1 = arith.constant 0 : i32
    return %arg0, %c0_i32, %c0_i32_0 : i32, i32, i32
  }
  func.func @transform_2(%arg0: i32, %arg1: i32) -> (i32, i32) {
    %c0_i32 = arith.constant 0 : i32
    %c0_i32_0 = arith.constant 0 : i32
    %c0_i32_1 = arith.constant 0 : i32
    return %c0_i32, %c0_i32_0 : i32, i32
  }
  func.func @transform_3(%arg0: i32, %arg1: i32) -> (i32, i32) {
    %c0_i32 = arith.constant 0 : i32
    %c0_i32_0 = arith.constant 0 : i32
    %c0_i32_1 = arith.constant 0 : i32
    return %c0_i32, %c0_i32_0 : i32, i32
  }
  func.func @transform_4(%arg0: i32, %arg1: i32) -> (i32, i32) {
    %c0_i32 = arith.constant 0 : i32
    %c0_i32_0 = arith.constant 0 : i32
    %c0_i32_1 = arith.constant 0 : i32
    return %c0_i32, %c0_i32_0 : i32, i32
  }
  func.func @transform_5(%arg0: i32, %arg1: i32) -> (i32, i32) {
    %c0_i32 = arith.constant 0 : i32
    %c0_i32_0 = arith.constant 0 : i32
    %c0_i32_1 = arith.constant 0 : i32
    return %c0_i32, %c0_i32_0 : i32, i32
  }
  func.func @transform_6(%arg0: i32, %arg1: i32) -> (i32, i32, i32) {
    %c0_i32 = arith.constant 0 : i32
    %c0_i32_0 = arith.constant 0 : i32
    return %arg0, %c0_i32, %arg1 : i32, i32, i32
  }
}

</mosaic_0001>

<bundles_post_ra>
// kernel: nonlocal_embedded_gaussian_forward.1
= control target key start
LH: loop header
LB: loop body
LE: loop exit
PB: predicated region body
PF: predicated region fallthrough
CT: control target
= control target key end

     0   :  { %s1524_s21 = smov 0   ;;  %s1526_s22 = smov 0   ;;  %s1888_s0 = inlined_call_operand.vmem [shape: f32[2,256,16], index: 0, kind: input, shape index: {}]   ;;  %s1889_s1 = inlined_call_operand.vmem [shape: f32[2,64,16], index: 1, kind: input, shape index: {}]   ;;  %s1890_s2 = inlined_call_operand.vmem [shape: f32[16,128], index: 2, kind: input, shape index: {}]   ;;  %s1891_s3 = inlined_call_operand.vmem [shape: f32[1,128], index: 3, kind: input, shape index: {}]   ;;  %s1892_s4 = inlined_call_operand.vmem [shape: f32[16,128], index: 4, kind: input, shape index: {}]   ;;  %s1893_s5 = inlined_call_operand.vmem [shape: f32[1,128], index: 5, kind: input, shape index: {}]   ;;  %s1894_s6 = inlined_call_operand.vmem [shape: f32[2,16,256], index: 6, kind: output, shape index: {}]  }
   0x1   :  { %s1528_s23 = smov 0   ;;  %s1530_s24 = smov 0  }
   0x2   :  { %s1532_s25 = smov 0   ;;  %s1534_s26 = smov 0  }
   0x3   :  { %s1536_s27 = smov 0  }
   0x4 LB: > { %s25_s28 = sadd.s32 1, %s1479_s25  ;;  %s28_s29 = sadd.s32 1, %s1483_s26  ;;  %s1487_s27 = sphi %s1536_s27, %s16_s27   ;;  %s1483_s26 = sphi %s1534_s26, %s1901_s26   ;;  %s1479_s25 = sphi %s1532_s25, %s1900_s25   ;;  %s1475_s24 = sphi %s1530_s24, %s1899_s24   ;;  %s1471_s23 = sphi %s1528_s23, %s1898_s23   ;;  %s1467_s22 = sphi %s1526_s22, %s1897_s22   ;;  %s1463_s21 = sphi %s1524_s21, %s1896_s21  }
   0x5   : > { %p26_p0 = scmp.ge.s32.totalorder %s25_s28, 2  ;;  %s1238_s30 = sadd.s32 4294967295, %s1487_s27  }
   0x6   : > { %p185_p1 = scmp.ne.s32.totalorder %s1467_s22, %s1463_s21  ;;  %p186_p2 = scmp.eq.s32.totalorder %s1238_s30, 3 }
   0x7   : > { %s1903_s28 = smov (%p26_p0, %s25_s28), 0  ;;  %s1905_s29 = smov (!%p26_p0, %s28_s29), %s1483_s26 }
   0x8   : > { %s171_s7 = ssub.s32 %s1479_s25, %s1903_s28  ;;  %p30_p3 = scmp.ge.s32.totalorder %s1905_s29, 2 }
   0x9   : > { %p1242_p4 = scmp.ge.s32.totalorder %s1487_s27, 1  ;;  %p1570_p5 = por %p186_p2, %p185_p1 }
   0xa   : > { %p243_p6 = scmp.lt.s32.totalorder %s1487_s27, 5  ;;  %s1907_s29 = smov (%p30_p3, %s1905_s29), 0 }
   0xb   : > { %s170_s9 = ssub.s32 %s1483_s26, %s1907_s29  ;;  %s175_s11 = sadd.s32 1, %s1467_s22 }
   0xc   : > { %p244_p7 = pnand %p1242_p4, %p243_p6  ;;  %s172_s10 = sor.u32 %s171_s7, %s170_s9 }
   0xd   : > { %p173_p8 = scmp.eq.s32.totalorder %s172_s10, 0  ;;  %p282_p9 = scmp.lt.s32.totalorder (!%p244_p7), %s1475_s24, 1 }
   0xe   : > { %247 = sbr.rel (%p244_p7) target bundleno = 854 (0x356), region = 44  ;;  %s1244_s18 = sshll.u32 (!%p244_p7), %s1471_s23, 4 }
   0xf   : > { %s1581_s12 = scalar_select %p173_p8, %s1467_s22, %s175_s11  }
  0x10   : > { %p284_p10 = scmp.lt.s32.totalorder (!%p244_p7), %s1244_s18, 31 }
  0x13   : > { %v441_v0 = vld [vmem:[%s1892_s4 + $0x8] sm:$0xff]  ;;  %v440_v1 = vld [vmem:[%s1892_s4] sm:$0xff]  ;;  %s283_s17 = scalar_select %p282_p9, %s1475_s24, 1  ;;  %vm326_vm0 = vcmask 130048   ;;  %vm576_vm1 = vcmask 523264  }
  0x14   : > { %484 = vmatpush.msra.mxu1 %v441_v0  ;;  %s1909_s18 = smov (!%p284_p10, %s1244_s18), 31  ;;  %v321_v5 = vld [vmem:[%s1890_s2 + $0x8] sm:$0xff]  ;;  %v320_v6 = vld [vmem:[%s1890_s2] sm:$0xff]  ;;  %s1290_s14 = sshll.u32 (%p1570_p5), %s1475_s24, 2 }
  0x15   : > { %s1294_s19 = sshll.u32 %s283_s17, 6  ;;  %s1245_s9 = sshll.u32 %s283_s17, 5  ;;  %389 = vmatpush.msra.mxu0 %v321_v5  ;;  %v1367_v39 = vld [vmem:[%s1893_s5] ss:$0 sm:$0xff] }
  0x16   : > { %485 = vmatpush.msra.mxu1 %v440_v1  ;;  %s1595_s7 = scalar_lea.vmem %s1889_s1, %s1294_s19  ;;  %s287_s10 = sadd.s32 %s1245_s9, %s1909_s18  ;;  %v1368_v52 = vld [vmem:[%s1891_s3] ss:$0 sm:$0xff] }
  0x17   : > { %v312_v2 = vld [vmem:[%s1595_s7] sm:$0xff]  ;;  %v313_v3 = vld [vmem:[%s1595_s7 + $0x8] sm:$0xff]  ;;  %s1246_s11 = sshll.u32 %s287_s10, 3  ;;  %v314_v4 = vld [vmem:[%s1595_s7 + $0x10] sm:$0xff]  ;;  %390 = vmatpush.msra.mxu0 %v320_v6  ;;  %s278_s10 = sand.u32 1, %s1463_s21  }
  0x18   : > { %1265 = vmatmul.msk.f32.vlgmr.msra.gmra.mxu1 %vm326_vm0, %v312_v2  ;;  %s1605_s15 = scalar_lea.vmem %s1888_s0, %s1246_s11  ;;  %v315_v8 = vld [vmem:[%s1595_s7 + $0x18] sm:$0xff]  ;;  %v316_v10 = vld [vmem:[%s1595_s7 + $0x20] sm:$0xff]  ;;  %v317_v12 = vld [vmem:[%s1595_s7 + $0x28] sm:$0xff]  ;;  %s1243_s11 = sshll.u32 %s278_s10, 4 }
  0x19   : > { %v296_v7 = vld [vmem:[%s1605_s15] sm:$0xff]  ;;  %v297_v9 = vld [vmem:[%s1605_s15 + $0x8] sm:$0xff]  ;;  %v298_v11 = vld [vmem:[%s1605_s15 + $0x10] sm:$0xff]  ;;  %s280_s13 = scalar_lea.vmem [#allocation2], %s1243_s11 }
  0x1a   : > { %1249 = vmatmul.msk.f32.vlgmr.msra.gmra.mxu0 %vm326_vm0, %v296_v7  ;;  %v299_v13 = vld [vmem:[%s1605_s15 + $0x18] sm:$0xff]  ;;  %v318_v14 = vld [vmem:[%s1595_s7 + $0x30] sm:$0xff]  ;;  %v300_v15 = vld [vmem:[%s1605_s15 + $0x20] sm:$0xff] }
  0x1b   : > { %v319_v16 = vld [vmem:[%s1595_s7 + $0x38] sm:$0xff]  ;;  %v301_v17 = vld [vmem:[%s1605_s15 + $0x28] sm:$0xff]  ;;  %v302_v18 = vld [vmem:[%s1605_s15 + $0x30] sm:$0xff] }
  0x1c   : > { %v303_v19 = vld [vmem:[%s1605_s15 + $0x38] sm:$0xff]  ;;  %v304_v20 = vld [vmem:[%s1605_s15 + $0x40] sm:$0xff]  ;;  %v305_v21 = vld [vmem:[%s1605_s15 + $0x48] sm:$0xff] }
  0x1d   : > { %v306_v22 = vld [vmem:[%s1605_s15 + $0x50] sm:$0xff]  ;;  %v307_v23 = vld [vmem:[%s1605_s15 + $0x58] sm:$0xff]  ;;  %v308_v24 = vld [vmem:[%s1605_s15 + $0x60] sm:$0xff] }
  0x1e   : > { %v309_v26 = vld [vmem:[%s1605_s15 + $0x68] sm:$0xff]  ;;  %v310_v28 = vld [vmem:[%s1605_s15 + $0x70] sm:$0xff]  ;;  %v311_v30 = vld [vmem:[%s1605_s15 + $0x78] sm:$0xff]  ;;  %s1116_s15 = sadd.s32 (%p1570_p5), %s1471_s23, %s1290_s14 }
  0x1f   : > { %s1291_s16 = sshll.u32 (%p1570_p5), %s1116_s15, 3 }
  0x20   : > { %1266 = vmatmul.msk.f32.gmra.mxu1 %vm326_vm0, %v313_v3  ;;  %s1118_s21 = scalar_lea.vmem (%p1570_p5), %s1894_s6, %s1291_s16 }
  0x22   : > { %1250 = vmatmul.msk.f32.gmra.mxu0 %vm326_vm0, %v297_v9 }
  0x28   : > { %1267 = vmatmul.msk.f32.gmra.mxu1 %vm326_vm0, %v314_v4 }
  0x2a   : > { %1251 = vmatmul.msk.f32.gmra.mxu0 %vm326_vm0, %v298_v11 }
  0x30   : > { %1268 = vmatmul.msk.f32.gmra.mxu1 %vm326_vm0, %v315_v8 }
  0x32   : > { %1252 = vmatmul.msk.f32.gmra.mxu0 %vm326_vm0, %v299_v13 }
  0x38   : > { %1269 = vmatmul.msk.f32.gmra.mxu1 %vm326_vm0, %v316_v10 }
  0x3a   : > { %1253 = vmatmul.msk.f32.gmra.mxu0 %vm326_vm0, %v300_v15 }
  0x40   : > { %1270 = vmatmul.msk.f32.gmra.mxu1 %vm326_vm0, %v317_v12 }
  0x42   : > { %1254 = vmatmul.msk.f32.gmra.mxu0 %vm326_vm0, %v301_v17 }
  0x48   : > { %1271 = vmatmul.msk.f32.gmra.mxu1 %vm326_vm0, %v318_v14 }
  0x4a   : > { %1255 = vmatmul.msk.f32.gmra.mxu0 %vm326_vm0, %v302_v18 }
  0x50   : > { %1272 = vmatmul.msk.f32.gmra.mxu1 %vm326_vm0, %v319_v16 }
  0x52   : > { %1256 = vmatmul.msk.f32.gmra.mxu0 %vm326_vm0, %v303_v19 }
  0x5a   : > { %1257 = vmatmul.msk.f32.gmra.mxu0 %vm326_vm0, %v304_v20 }
  0x62   : > { %1258 = vmatmul.msk.f32.gmra.mxu0 %vm326_vm0, %v305_v21 }
  0x6a   : > { %1259 = vmatmul.msk.f32.gmra.mxu0 %vm326_vm0, %v306_v22 }
  0x72   : > { %1260 = vmatmul.msk.f32.gmra.mxu0 %vm326_vm0, %v307_v23 }
  0x7a   : > { %1261 = vmatmul.msk.f32.gmra.mxu0 %vm326_vm0, %v308_v24 }
  0x82   : > { %1262 = vmatmul.msk.f32.gmra.mxu0 %vm326_vm0, %v309_v26 }
  0x8a   : > { %1263 = vmatmul.msk.f32.gmra.mxu0 %vm326_vm0, %v310_v28 }
  0x92   : > { %1264 = vmatmul.msk.f32.gmra.mxu0 %vm326_vm0, %v311_v30 }
  0x95   : > { %v487_v25 = vpop.f32.mrf.mxu1 }
  0x96   : > { %v488_v50 = vadd.f32 %v1367_v39, %v487_v25 }
  0x97   : > { %v392_v31 = vpop.f32.mrf.mxu0 }
  0x98   : > { %v393_v54 = vadd.f32 %v1368_v52, %v392_v31 }
  0x9d   : > { %v490_v27 = vpop.f32.mrf.mxu1 }
  0x9e   : > { %v491_v48 = vadd.f32 %v1367_v39, %v490_v27 }
  0x9f   : > { %v395_v33 = vpop.f32.mrf.mxu0 }
  0xa0   : > { %v396_v57 = vadd.f32 %v1368_v52, %v395_v33 }
  0xa5   : > { %v493_v29 = vpop.f32.mrf.mxu1 }
  0xa6   : > { %v494_v47 = vadd.f32 %v1367_v39, %v493_v29 }
  0xa7   : > { %v398_v36 = vpop.f32.mrf.mxu0 }
  0xa8   : > { %v399_v60 = vadd.f32 %v1368_v52, %v398_v36 }
  0xad   : > { %v496_v32 = vpop.f32.mrf.mxu1 }
  0xae   : > { %v497_v46 = vadd.f32 %v1367_v39, %v496_v32 }
  0xaf   : > { %v1656_v38 = vpop.f32.mrf.mxu0 }
  0xb0   : > { %v402_v63 = vadd.f32 %v1368_v52, %v1656_v38 }
  0xb5   : > { %v499_v34 = vpop.f32.mrf.mxu1 }
  0xb6   : > { %v500_v45 = vadd.f32 %v1367_v39, %v499_v34 }
  0xb7   : > { %v404_v43 = vpop.f32.mrf.mxu0 }
  0xb8   : > { %v405_v53 = vadd.f32 %v1368_v52, %v404_v43 }
  0xbd   : > { %v502_v35 = vpop.f32.mrf.mxu1 }
  0xbe   : > { %v503_v44 = vadd.f32 %v1367_v39, %v502_v35 }
  0xbf   : > { %v407_v49 = vpop.f32.mrf.mxu0 }
  0xc0   : > { %v408_v56 = vadd.f32 %v1368_v52, %v407_v49 }
  0xc5   : > { %v505_v37 = vpop.f32.mrf.mxu1 }
  0xc6   : > { %v506_v42 = vadd.f32 %v1367_v39, %v505_v37 }
  0xc7   : > { %v410_v51 = vpop.f32.mrf.mxu0 }
  0xc8   : > { %v411_v59 = vadd.f32 %v1368_v52, %v410_v51 }
  0xcd   : > { %v508_v40 = vpop.f32.mrf.mxu1 }
  0xce   : > { %v509_v41 = vadd.f32 %v1367_v39, %v508_v40 }
  0xcf   : > { %v413_v55 = vpop.f32.mrf.mxu0 }
  0xd0   : > { %519 = vmatpush.xpose.msrb.mxu1 %v509_v41  ;;  %1295 = vmatpush.xpose.msra.mxu2 %v509_v41  ;;  %v414_v61 = vadd.f32 %v1368_v52, %v413_v55 }
  0xd1   : > { %1303 = vmatpush.msra.mxu3 %v509_v41 }
  0xd3   : > { %1304 = vmatpush.msra.mxu3 %v506_v42 }
  0xd4   : > { %520 = vmatpush.xpose.msrb.mxu1 %v506_v42  ;;  %1296 = vmatpush.xpose.msra.mxu2 %v506_v42 }
  0xd5   : > { %1305 = vmatpush.msra.mxu3 %v503_v44 }
  0xd7   : > { %1306 = vmatpush.msra.mxu3 %v500_v45  ;;  %v416_v58 = vpop.f32.mrf.mxu0 }
  0xd8   : > { %521 = vmatpush.xpose.msrb.mxu1 %v503_v44  ;;  %1297 = vmatpush.xpose.msra.mxu2 %v503_v44  ;;  %v417_v0 = vadd.f32 %v1368_v52, %v416_v58 }
  0xd9   : > { %1307 = vmatpush.msra.mxu3 %v497_v46 }
  0xdb   : > { %1308 = vmatpush.msra.mxu3 %v494_v47 }
  0xdc   : > { %522 = vmatpush.xpose.msrb.mxu1 %v500_v45  ;;  %1298 = vmatpush.xpose.msra.mxu2 %v500_v45 }
  0xdd   : > { %1309 = vmatpush.msra.mxu3 %v491_v48 }
  0xdf   : > { %1310 = vmatpush.msra.mxu3 %v488_v50  ;;  %v419_v62 = vpop.f32.mrf.mxu0 }
  0xe0   : > { %523 = vmatpush.xpose.msrb.mxu1 %v497_v46  ;;  %1299 = vmatpush.xpose.msra.mxu2 %v497_v46  ;;  %v420_v2 = vadd.f32 %v1368_v52, %v419_v62 }
  0xe4   : > { %524 = vmatpush.xpose.msrb.mxu1 %v494_v47  ;;  %1300 = vmatpush.xpose.msra.mxu2 %v494_v47 }
  0xe7   : > { %v422_v1 = vpop.f32.mrf.mxu0 }
  0xe8   : > { %525 = vmatpush.xpose.msrb.mxu1 %v491_v48  ;;  %1301 = vmatpush.xpose.msra.mxu2 %v491_v48  ;;  %v423_v4 = vadd.f32 %v1368_v52, %v422_v1 }
  0xec   : > { %526 = vmatpush.xpose.msrb.mxu1 %v488_v50  ;;  %1302 = vmatpush.xpose.msra.mxu2 %v488_v50 }
  0xef   : > { %527 = vmatmul.f32.vlgmr.msrb.gmra.mxu1 %v393_v54  ;;  %539 = vmatmul.f32.vlgmr.msra.gmra.mxu2 %v405_v53  ;;  %v425_v3 = vpop.f32.mrf.mxu0 }
  0xf0   : > { %1001 = vmatpush.msra.mxu1 %v509_v41  ;;  %v426_v6 = vadd.f32 %v1368_v52, %v425_v3 }
  0xf2   : > { %1002 = vmatpush.msra.mxu1 %v506_v42 }
  0xf4   : > { %1003 = vmatpush.msra.mxu1 %v503_v44 }
  0xf6   : > { %1004 = vmatpush.msra.mxu1 %v500_v45 }
  0xf7   : > { %530 = vmatmul.f32.gmra.mxu1 %v396_v57  ;;  %542 = vmatmul.f32.gmra.mxu2 %v408_v56  ;;  %v428_v5 = vpop.f32.mrf.mxu0 }
  0xf8   : > { %1005 = vmatpush.msra.mxu1 %v497_v46  ;;  %v429_v7 = vadd.f32 %v1368_v52, %v428_v5 }
  0xfa   : > { %1006 = vmatpush.msra.mxu1 %v494_v47 }
  0xfc   : > { %1007 = vmatpush.msra.mxu1 %v491_v48 }
  0xfe   : > { %1008 = vmatpush.msra.mxu1 %v488_v50 }
  0xff   : > { %533 = vmatmul.f32.gmra.mxu1 %v399_v60  ;;  %545 = vmatmul.f32.gmra.mxu2 %v411_v59  ;;  %v431_v8 = vpop.f32.mrf.mxu0 }
 0x100   : > { %v432_v9 = vadd.f32 %v1368_v52, %v431_v8 }
 0x107   : > { %536 = vmatmul.f32.gmra.mxu1 %v402_v63  ;;  %548 = vmatmul.f32.gmra.mxu2 %v414_v61  ;;  %v434_v10 = vpop.f32.mrf.mxu0 }
 0x108   : > { %v435_v11 = vadd.f32 %v1368_v52, %v434_v10 }
 0x10f   : > { %551 = vmatmul.f32.gmra.mxu2 %v417_v0  ;;  %v437_v12 = vpop.f32.mrf.mxu0 }
 0x110   : > { %v438_v13 = vadd.f32 %v1368_v52, %v437_v12 }
 0x117   : > { %554 = vmatmul.f32.gmra.mxu2 %v420_v2 }
 0x11f   : > { %557 = vmatmul.f32.gmra.mxu2 %v423_v4 }
 0x127   : > { %560 = vmatmul.f32.gmra.mxu2 %v426_v6 }
 0x12f   : > { %563 = vmatmul.f32.gmra.mxu2 %v429_v7 }
 0x137   : > { %566 = vmatmul.f32.gmra.mxu2 %v432_v9 }
 0x13f   : > { %569 = vmatmul.f32.gmra.mxu2 %v435_v11 }
 0x147   : > { %572 = vmatmul.f32.gmra.mxu2 %v438_v13 }
 0x16c   : > { %v1665_v14 = vpop.f32.mrf.mxu1 }
 0x16d   : > { %v577_v29 = vsel %vm576_vm1, %v1665_v14, -inf }
 0x172   : > { %v1667_v15 = vpop.f32.mrf.mxu2 }
 0x173   : > { %v589_v16 = vsel %vm576_vm1, %v1667_v15, -inf }
 0x174   : > { %590 = vmax.xlane.f32.xlu1 %v589_v16  ;;  %v1671_v17 = vpop.f32.mrf.mxu1 }
 0x175   : > { %v580_v34 = vsel %vm576_vm1, %v1671_v17, -inf }
 0x17a   : > { %v543_v18 = vpop.f32.mrf.mxu2 }
 0x17b   : > { %v592_v19 = vsel %vm576_vm1, %v543_v18, -inf }
 0x17c   : > { %593 = vmax.xlane.f32.xlu1 %v592_v19  ;;  %v534_v20 = vpop.f32.mrf.mxu1 }
 0x17d   : > { %v583_v21 = vsel %vm576_vm1, %v534_v20, -inf }
 0x17e   : > { %584 = vmax.xlane.f32.xlu0 %v583_v21 }
 0x182   : > { %v1675_v22 = vpop.f32.mrf.mxu2 }
 0x183   : > { %v595_v23 = vsel %vm576_vm1, %v1675_v22, -inf }
 0x184   : > { %596 = vmax.xlane.f32.xlu2 %v595_v23  ;;  %v537_v24 = vpop.f32.mrf.mxu1 }
 0x185   : > { %v586_v25 = vsel %vm576_vm1, %v537_v24, -inf }
 0x186   : > { %587 = vmax.xlane.f32.xlu0 %v586_v25 }
 0x18a   : > { %v1680_v26 = vpop.f32.mrf.mxu2 }
 0x18b   : > { %v598_v27 = vsel %vm576_vm1, %v1680_v26, -inf }
 0x18c   : > { %599 = vmax.xlane.f32.xlu2 %v598_v27 }
 0x192   : > { %v552_v28 = vpop.f32.mrf.mxu2 }
 0x193   : > { %v601_v30 = vsel %vm576_vm1, %v552_v28, -inf }
 0x194   : > { %578 = vmax.xlane.f32.xlu2 %v577_v29  ;;  %602 = vmax.xlane.f32.xlu0 %v601_v30 }
 0x19a   : > { %v1687_v31 = vpop.f32.mrf.mxu2 }
 0x19b   : > { %v604_v32 = vsel %vm576_vm1, %v1687_v31, -inf }
 0x19c   : > { %605 = vmax.xlane.f32.xlu1 %v604_v32 }
 0x1a2   : > { %v1691_v33 = vpop.f32.mrf.mxu2 }
 0x1a3   : > { %v607_v35 = vsel %vm576_vm1, %v1691_v33, -inf }
 0x1a4   : > { %581 = vmax.xlane.f32.xlu1 %v580_v34  ;;  %608 = vmax.xlane.f32.xlu0 %v607_v35 }
 0x1aa   : > { %v1697_v36 = vpop.f32.mrf.mxu2 }
 0x1ab   : > { %v610_v37 = vsel %vm576_vm1, %v1697_v36, -inf }
 0x1ac   : > { %611 = vmax.xlane.f32.xlu2 %v610_v37 }
 0x1b2   : > { %v1701_v38 = vpop.f32.mrf.mxu2 }
 0x1b3   : > { %v613_v39 = vsel %vm576_vm1, %v1701_v38, -inf }
 0x1b4   : > { %614 = vmax.xlane.f32.xlu0 %v613_v39 }
 0x1ba   : > { %v1705_v40 = vpop.f32.mrf.mxu2 }
 0x1bb   : > { %v616_v41 = vsel %vm576_vm1, %v1705_v40, -inf }
 0x1bc   : > { %617 = vmax.xlane.f32.xlu1 %v616_v41 }
 0x1c2   : > { %v1709_v42 = vpop.f32.mrf.mxu2 }
 0x1c3   : > { %v619_v43 = vsel %vm576_vm1, %v1709_v42, -inf }
 0x1c4   : > { %620 = vmax.xlane.f32.xlu2 %v619_v43 }
 0x1ca   : > { %v1713_v44 = vpop.f32.mrf.mxu2 }
 0x1cb   : > { %v622_v45 = vsel %vm576_vm1, %v1713_v44, -inf }
 0x1cc   : > { %623 = vmax.xlane.f32.xlu0 %v622_v45 }
 0x1e7   : > { %v591_v46 = vpop.xlane.xlu1 %590 }
 0x1e8   : > { %v629_v59 = vsub.f32 %v1667_v15, %v591_v46 }
 0x1ea   : > { %v649_v62 = vmul.f32 1.442695, %v629_v59 }
 0x1ef   : > { %v594_v47 = vpop.xlane.xlu1 %593 }
 0x1f0   : > { %v630_v50 = vsub.f32 %v543_v18, %v594_v47 }
 0x1f1   : > { %v585_v48 = vpop.xlane.xlu0 %584 }
 0x1f2   : > { %v627_v49 = vsub.f32 %v534_v20, %v585_v48  ;;  %v651_v53 = vmul.f32 1.442695, %v630_v50 }
 0x1f4   : > { %v645_v51 = vmul.f32 1.442695, %v627_v49 }
 0x1f6   : > { %1369 = vpow2.f32 %v645_v51 }
 0x1f7   : > { %v597_v52 = vpop.xlane.xlu2 %596  ;;  %1371 = vpow2.f32 %v651_v53 }
 0x1f8   : > { %v631_v8 = vsub.f32 %v1675_v22, %v597_v52 }
 0x1f9   : > { %v588_v54 = vpop.xlane.xlu0 %587 }
 0x1fa   : > { %v628_v55 = vsub.f32 %v537_v24, %v588_v54  ;;  %v653_v11 = vmul.f32 1.442695, %v631_v8 }
 0x1fc   : > { %v1370_v56 = vpop.eup %1369  ;;  %v647_v57 = vmul.f32 1.442695, %v628_v55 }
 0x1fd   : > { %1275 = vmatmul.msk.f32.vlgmr.msra.gmra.mxu3 %vm576_vm1, %v1370_v56  ;;  %v679_v58 = vsel %vm576_vm1, %v1370_v56, 0.0  ;;  %v1372_v61 = vpop.eup %1371 }
 0x1fe   : > { %1373 = vpow2.f32 %v647_v57  ;;  %680 = vadd.xlane.f32.xlu0 %v679_v58  ;;  %v688_v0 = vsel %vm576_vm1, %v1372_v61, 0.0 }
 0x1ff   : > { %v600_v60 = vpop.xlane.xlu2 %599  ;;  %1375 = vpow2.f32 %v649_v62 }
 0x200   : > { %v632_v15 = vsub.f32 %v1680_v26, %v600_v60 }
 0x202   : > { %v655_v19 = vmul.f32 1.442695, %v632_v15 }
 0x204   : > { %v1374_v63 = vpop.eup %1373 }
 0x205   : > { %1276 = vmatmul.msk.f32.gmra.mxu3 %vm576_vm1, %v1374_v63  ;;  %v1376_v7 = vpop.eup %1375  ;;  %v682_v22 = vsel %vm576_vm1, %v1374_v63, 0.0 }
 0x206   : > { %689 = vadd.xlane.f32.xlu0 %v688_v0  ;;  %v685_v41 = vsel %vm576_vm1, %v1376_v7, 0.0 }
 0x207   : > { %v579_v1 = vpop.xlane.xlu2 %578  ;;  %v603_v2 = vpop.xlane.xlu0 %602 }
 0x208   : > { %v625_v3 = vsub.f32 %v1665_v14, %v579_v1  ;;  %v633_v4 = vsub.f32 %v552_v28, %v603_v2 }
 0x20a   : > { %v641_v5 = vmul.f32 1.442695, %v625_v3  ;;  %v657_v6 = vmul.f32 1.442695, %v633_v4 }
 0x20c   : > { %1377 = vpow2.f32 %v641_v5 }
 0x20d   : > { %1379 = vpow2.f32 %v657_v6  ;;  %1277 = vmatmul.msk.f32.gmra.mxu3 %vm576_vm1, %v1376_v7 }
 0x20e   : > { %1381 = vpow2.f32 %v653_v11 }
 0x20f   : > { %v606_v9 = vpop.xlane.xlu1 %605 }
 0x210   : > { %v634_v20 = vsub.f32 %v1687_v31, %v606_v9 }
 0x212   : > { %v1378_v10 = vpop.eup %1377  ;;  %v659_v24 = vmul.f32 1.442695, %v634_v20 }
 0x213   : > { %v1380_v12 = vpop.eup %1379  ;;  %1273 = vmatmul.msk.f32.vlgmr.msra.gmra.mxu1 %vm576_vm1, %v1378_v10  ;;  %v673_v13 = vsel %vm576_vm1, %v1378_v10, 0.0 }
 0x214   : > { %674 = vadd.xlane.f32.xlu1 %v673_v13  ;;  %v697_v14 = vsel %vm576_vm1, %v1380_v12, 0.0  ;;  %v1382_v23 = vpop.eup %1381 }
 0x215   : > { %698 = vadd.xlane.f32.xlu0 %v697_v14  ;;  %1278 = vmatmul.msk.f32.gmra.mxu3 %vm576_vm1, %v1372_v61  ;;  %v691_v30 = vsel %vm576_vm1, %v1382_v23, 0.0 }
 0x217   : > { %v582_v16 = vpop.xlane.xlu1 %581  ;;  %v609_v25 = vpop.xlane.xlu0 %608 }
 0x218   : > { %v626_v18 = vsub.f32 %v1671_v17, %v582_v16  ;;  %v635_v37 = vsub.f32 %v1691_v33, %v609_v25 }
 0x21a   : > { %v643_v21 = vmul.f32 1.442695, %v626_v18  ;;  %v661_v46 = vmul.f32 1.442695, %v635_v37 }
 0x21c   : > { %1383 = vpow2.f32 %v643_v21  ;;  %683 = vadd.xlane.f32.xlu1 %v682_v22 }
 0x21d   : > { %1279 = vmatmul.msk.f32.gmra.mxu3 %vm576_vm1, %v1382_v23  ;;  %1385 = vpow2.f32 %v655_v19 }
 0x21e   : > { %1387 = vpow2.f32 %v659_v24 }
 0x21f   : > { %v612_v27 = vpop.xlane.xlu2 %611 }
 0x220   : > { %v636_v26 = vsub.f32 %v1697_v36, %v612_v27 }
 0x222   : > { %v1384_v28 = vpop.eup %1383  ;;  %v663_v17 = vmul.f32 1.442695, %v636_v26 }
 0x223   : > { %1274 = vmatmul.msk.f32.gmra.mxu1 %vm576_vm1, %v1384_v28  ;;  %v676_v29 = vsel %vm576_vm1, %v1384_v28, 0.0  ;;  %v1386_v31 = vpop.eup %1385 }
 0x224   : > { %1389 = vpow2.f32 %v663_v17  ;;  %677 = vadd.xlane.f32.xlu2 %v676_v29  ;;  %692 = vadd.xlane.f32.xlu1 %v691_v30  ;;  %v1388_v34 = vpop.eup %1387  ;;  %v694_v33 = vsel %vm576_vm1, %v1386_v31, 0.0 }
 0x225   : > { %1280 = vmatmul.msk.f32.gmra.mxu3 %vm576_vm1, %v1386_v31  ;;  %v700_v43 = vsel %vm576_vm1, %v1388_v34, 0.0 }
 0x227   : > { %v615_v32 = vpop.xlane.xlu0 %614 }
 0x228   : > { %v637_v35 = vsub.f32 %v1701_v38, %v615_v32 }
 0x22a   : > { %v1390_v36 = vpop.eup %1389  ;;  %v665_v39 = vmul.f32 1.442695, %v637_v35 }
 0x22b   : > { %v706_v45 = vsel %vm576_vm1, %v1390_v36, 0.0 }
 0x22c   : > { %1391 = vpow2.f32 %v665_v39  ;;  %686 = vadd.xlane.f32.xlu2 %v685_v41  ;;  %701 = vadd.xlane.f32.xlu1 %v700_v43 }
 0x22d   : > { %707 = vadd.xlane.f32.xlu0 %v706_v45  ;;  %1281 = vmatmul.msk.f32.gmra.mxu3 %vm576_vm1, %v1380_v12  ;;  %1393 = vpow2.f32 %v661_v46 }
 0x22f   : > { %v618_v47 = vpop.xlane.xlu1 %617 }
 0x230   : > { %v638_v38 = vsub.f32 %v1705_v40, %v618_v47 }
 0x232   : > { %v1392_v48 = vpop.eup %1391  ;;  %v667_v50 = vmul.f32 1.442695, %v638_v38 }
 0x233   : > { %v709_v49 = vsel %vm576_vm1, %v1392_v48, 0.0  ;;  %v1394_v52 = vpop.eup %1393 }
 0x234   : > { %695 = vadd.xlane.f32.xlu2 %v694_v33  ;;  %710 = vadd.xlane.f32.xlu1 %v709_v49  ;;  %1395 = vpow2.f32 %v667_v50  ;;  %v703_v55 = vsel %vm576_vm1, %v1394_v52, 0.0 }
 0x235   : > { %1282 = vmatmul.msk.f32.gmra.mxu3 %vm576_vm1, %v1388_v34 }
 0x237   : > { %v621_v51 = vpop.xlane.xlu2 %620 }
 0x238   : > { %v639_v53 = vsub.f32 %v1709_v42, %v621_v51 }
 0x23a   : > { %v669_v54 = vmul.f32 1.442695, %v639_v53  ;;  %v1396_v56 = vpop.eup %1395 }
 0x23b   : > { %v712_v61 = vsel %vm576_vm1, %v1396_v56, 0.0 }
 0x23c   : > { %1397 = vpow2.f32 %v669_v54  ;;  %704 = vadd.xlane.f32.xlu2 %v703_v55 }
 0x23d   : > { %1283 = vmatmul.msk.f32.gmra.mxu3 %vm576_vm1, %v1394_v52 }
 0x23f   : > { %v624_v40 = vpop.xlane.xlu0 %623 }
 0x240   : > { %v640_v57 = vsub.f32 %v1713_v44, %v624_v40 }
 0x242   : > { %v1398_v58 = vpop.eup %1397  ;;  %v671_v59 = vmul.f32 1.442695, %v640_v57 }
 0x243   : > { %v715_v60 = vsel %vm576_vm1, %v1398_v58, 0.0 }
 0x244   : > { %1399 = vpow2.f32 %v671_v59  ;;  %716 = vadd.xlane.f32.xlu0 %v715_v60  ;;  %713 = vadd.xlane.f32.xlu2 %v712_v61 }
 0x245   : > { %1284 = vmatmul.msk.f32.gmra.mxu3 %vm576_vm1, %v1390_v36 }
 0x24a   : > { %v1400_v42 = vpop.eup %1399 }
 0x24b   : > { %v718_v62 = vsel %vm576_vm1, %v1400_v42, 0.0 }
 0x24c   : > { %719 = vadd.xlane.f32.xlu1 %v718_v62 }
 0x24d   : > { %1285 = vmatmul.msk.f32.gmra.mxu3 %vm576_vm1, %v1392_v48 }
 0x255   : > { %1286 = vmatmul.msk.f32.gmra.mxu3 %vm576_vm1, %v1396_v56 }
 0x25d   : > { %1287 = vmatmul.msk.f32.gmra.mxu3 %vm576_vm1, %v1398_v58 }
 0x265   : > { %1288 = vmatmul.msk.f32.gmra.mxu3 %vm576_vm1, %v1400_v42 }
 0x271   : > { %v1761_v0 = vpop.xlane.xlu0 %680 }
 0x272   : > { %v760_v36 = vand.u32 2147483648, %v1761_v0  ;;  %vm754_vm11 = vweird.f32 %v1761_v0  ;;  %v758_v45 = vand.u32 2147483647, %v1761_v0 }
 0x274   : > { %v761_v33 = vor.u32 1.1754944e-38, %v760_v36  ;;  %vm759_vm13 = vcmp.eq.f32.partialorder %v758_v45, 8.507059e+37 }
 0x279   : > { %v1777_v43 = vpop.xlane.xlu0 %689 }
 0x280   : > { %v1764_v6 = vpop.f32.mrf.mxu3 }
 0x287   : > { %v675_v44 = vpop.xlane.xlu1 %674 }
 0x288   : > { %1401 = vrcp.f32 %v675_v44  ;;  %v732_v3 = vand.u32 2147483648, %v675_v44  ;;  %v730_v5 = vand.u32 2147483647, %v675_v44  ;;  %vm726_vm3 = vweird.f32 %v675_v44  ;;  %v1770_v20 = vpop.f32.mrf.mxu3 }
 0x289   : > { %1403 = vrcp.f32 %v1761_v0 }
 0x28a   : > { %v733_v8 = vor.u32 1.1754944e-38, %v732_v3  ;;  %vm731_vm5 = vcmp.eq.f32.partialorder %v730_v5, 8.507059e+37 }
 0x28e   : > { %v1402_v63 = vpop.eup %1401 }
 0x28f   : > { %v722_v1 = vmul.f32 %v1402_v63, %v675_v44  ;;  %vm727_vm2 = vweird.f32 %v1402_v63  ;;  %v1404_v9 = vpop.eup %1403  ;;  %v1766_v10 = vpop.xlane.xlu1 %683 }
 0x290   : > { %vm728_vm4 = vmor %vm726_vm3, %vm727_vm2  ;;  %v1010_v14 = vpop.f32.mrf.mxu1  ;;  %v750_v16 = vmul.f32 %v1404_v9, %v1761_v0  ;;  %vm755_vm8 = vweird.f32 %v1404_v9  ;;  %v1022_v37 = vpop.f32.mrf.mxu3  ;;  %v774_v53 = vand.u32 2147483648, %v1766_v10  ;;  %vm768_vm15 = vweird.f32 %v1766_v10 }
 0x291   : > { %v723_v2 = vsub.f32 1.0, %v722_v1  ;;  %vm756_vm12 = vmor %vm754_vm11, %vm755_vm8  ;;  %v772_v55 = vand.u32 2147483647, %v1766_v10 }
 0x292   : > { %v751_v19 = vsub.f32 1.0, %v750_v16  ;;  %v775_v59 = vor.u32 1.1754944e-38, %v774_v53 }
 0x293   : > { %v724_v4 = vmul.f32 %v1402_v63, %v723_v2  ;;  %vm773_vm1 = vcmp.eq.f32.partialorder %v772_v55, 8.507059e+37 }
 0x294   : > { %v752_v25 = vmul.f32 %v1404_v9, %v751_v19 }
 0x295   : > { %v725_v7 = vadd.f32 %v1402_v63, %v724_v4 }
 0x296   : > { %v753_v31 = vadd.f32 %v1404_v9, %v752_v25 }
 0x297   : > { %v729_v11 = vsel %vm728_vm4, %v1402_v63, %v725_v7  ;;  %v678_v12 = vpop.xlane.xlu2 %677  ;;  %v1784_v50 = vpop.xlane.xlu1 %692 }
 0x298   : > { %v734_v13 = vsel %vm731_vm5, %v733_v8, %v729_v11  ;;  %1405 = vrcp.f32 %v678_v12  ;;  %v746_v27 = vand.u32 2147483648, %v678_v12  ;;  %v744_v17 = vand.u32 2147483647, %v678_v12  ;;  %v1025_v56 = vpop.f32.mrf.mxu3  ;;  %v1800_v11 = vpop.xlane.xlu0 %698 }
 0x299   : > { %v1058_v15 = vmul.f32 %v1010_v14, %v734_v13  ;;  %1407 = vrcp.f32 %v1766_v10  ;;  %vm740_vm7 = vweird.f32 %v678_v12  ;;  %v757_v47 = vsel %vm756_vm12, %v1404_v9, %v753_v31 }
 0x29a   : > { %v747_v30 = vor.u32 1.1754944e-38, %v746_v27  ;;  %vm745_vm10 = vcmp.eq.f32.partialorder %v744_v17, 8.507059e+37  ;;  %v762_v49 = vsel %vm759_vm13, %v761_v33, %v757_v47  ;;  %v802_v14 = vand.u32 2147483648, %v1777_v43 }
 0x29b   : > { %1074 = vxpose.xlu2.b32.start [1/16] (narrow) %v1058_v15, 24  ;;  %v1060_v54 = vmul.f32 %v1764_v6, %v762_v49  ;;  %v800_v15 = vand.u32 2147483647, %v1777_v43  ;;  %v816_v25 = vand.u32 2147483648, %v1784_v50  ;;  %vm810_vm11 = vweird.f32 %v1784_v50 }
 0x29c   : > { %v844_v55 = vand.u32 2147483648, %v1800_v11 }
 0x29d   : > { %v817_v31 = vor.u32 1.1754944e-38, %v816_v25 }
 0x29e   : > { %v1406_v18 = vpop.eup %1405 }
 0x29f   : > { %v736_v21 = vmul.f32 %v1406_v18, %v678_v12  ;;  %v1772_v22 = vpop.xlane.xlu2 %686  ;;  %v1408_v23 = vpop.eup %1407  ;;  %vm741_vm6 = vweird.f32 %v1406_v18 }
 0x2a0   : > { %1409 = vrcp.f32 %v1772_v22  ;;  %v764_v26 = vmul.f32 %v1408_v23, %v1766_v10  ;;  %vm742_vm9 = vmor %vm740_vm7, %vm741_vm6  ;;  %v1013_v41 = vpop.f32.mrf.mxu1  ;;  %vm769_vm14 = vweird.f32 %v1408_v23  ;;  %v788_v63 = vand.u32 2147483648, %v1772_v22  ;;  %v1028_v6 = vpop.f32.mrf.mxu3 }
 0x2a1   : > { %v737_v24 = vsub.f32 1.0, %v736_v21  ;;  %1411 = vrcp.f32 %v1777_v43  ;;  %vm770_vm0 = vmor %vm768_vm15, %vm769_vm14  ;;  %vm782_vm3 = vweird.f32 %v1772_v22  ;;  %v786_v2 = vand.u32 2147483647, %v1772_v22 }
 0x2a2   : > { %v765_v32 = vsub.f32 1.0, %v764_v26  ;;  %1413 = vrcp.f32 %v1784_v50  ;;  %v789_v5 = vor.u32 1.1754944e-38, %v788_v63  ;;  %vm796_vm7 = vweird.f32 %v1777_v43  ;;  %v1808_v26 = vpop.xlane.xlu1 %701 }
 0x2a3   : > { %v738_v28 = vmul.f32 %v1406_v18, %v737_v24  ;;  %vm787_vm5 = vcmp.eq.f32.partialorder %v786_v2, 8.507059e+37  ;;  %v856_v2 = vand.u32 2147483647, %v1808_v26 }
 0x2a4   : > { %v766_v48 = vmul.f32 %v1408_v23, %v765_v32 }
 0x2a5   : > { %v739_v29 = vadd.f32 %v1406_v18, %v738_v28  ;;  %v814_v28 = vand.u32 2147483647, %v1784_v50 }
 0x2a6   : > { %v1410_v35 = vpop.eup %1409  ;;  %v767_v52 = vadd.f32 %v1408_v23, %v766_v48 }
 0x2a7   : > { %v743_v34 = vsel %vm742_vm9, %v1406_v18, %v739_v29  ;;  %v778_v38 = vmul.f32 %v1410_v35, %v1772_v22  ;;  %v1412_v40 = vpop.eup %1411  ;;  %v1792_v42 = vpop.xlane.xlu2 %695  ;;  %vm783_vm2 = vweird.f32 %v1410_v35  ;;  %vm801_vm9 = vcmp.eq.f32.partialorder %v800_v15, 8.507059e+37 }
 0x2a8   : > { %v748_v39 = vsel %vm745_vm10, %v747_v30, %v743_v34  ;;  %v771_v58 = vsel %vm770_vm0, %v1408_v23, %v767_v52  ;;  %v792_v60 = vmul.f32 %v1412_v40, %v1777_v43  ;;  %v1414_v44 = vpop.eup %1413  ;;  %1415 = vrcp.f32 %v1792_v42  ;;  %vm784_vm4 = vmor %vm782_vm3, %vm783_vm2  ;;  %v1031_v21 = vpop.f32.mrf.mxu3 }
 0x2a9   : > { %v1059_v46 = vmul.f32 %v1013_v41, %v748_v39  ;;  %v779_v51 = vsub.f32 1.0, %v778_v38  ;;  %v776_v61 = vsel %vm773_vm1, %v775_v59, %v771_v58  ;;  %v806_v3 = vmul.f32 %v1414_v44, %v1784_v50  ;;  %v1821_v52 = vpop.xlane.xlu0 %707 }
 0x2aa   : > { %v793_v0 = vsub.f32 1.0, %v792_v60  ;;  %v1061_v1 = vmul.f32 %v1770_v20, %v776_v61  ;;  %vm797_vm6 = vweird.f32 %v1412_v40  ;;  %1417 = vrcp.f32 %v1800_v11 }
 0x2ab   : > { %1075 = vxpose.xlu2.b32.cont [2/16] (narrow) %v1059_v46, 24  ;;  %v780_v57 = vmul.f32 %v1410_v35, %v779_v51  ;;  %v807_v9 = vsub.f32 1.0, %v806_v3  ;;  %vm798_vm8 = vmor %vm796_vm7, %vm797_vm6  ;;  %v803_v20 = vor.u32 1.1754944e-38, %v802_v14  ;;  %vm811_vm10 = vweird.f32 %v1414_v44 }
 0x2ac   : > { %v794_v7 = vmul.f32 %v1412_v40, %v793_v0  ;;  %vm812_vm12 = vmor %vm810_vm11, %vm811_vm10  ;;  %1419 = vrcp.f32 %v1808_v26  ;;  %vm815_vm13 = vcmp.eq.f32.partialorder %v814_v28, 8.507059e+37  ;;  %vm824_vm15 = vweird.f32 %v1792_v42 }
 0x2ad   : > { %v781_v62 = vadd.f32 %v1410_v35, %v780_v57  ;;  %v808_v16 = vmul.f32 %v1414_v44, %v807_v9  ;;  %v828_v45 = vand.u32 2147483647, %v1792_v42  ;;  %vm838_vm3 = vweird.f32 %v1800_v11 }
 0x2ae   : > { %v1416_v10 = vpop.eup %1415  ;;  %v795_v12 = vadd.f32 %v1412_v40, %v794_v7  ;;  %v842_v57 = vand.u32 2147483647, %v1800_v11  ;;  %v845_v60 = vor.u32 1.1754944e-38, %v844_v55  ;;  %vm852_vm7 = vweird.f32 %v1808_v26 }
 0x2af   : > { %v785_v4 = vsel %vm784_vm4, %v1410_v35, %v781_v62  ;;  %v820_v18 = vmul.f32 %v1416_v10, %v1792_v42  ;;  %v809_v22 = vadd.f32 %v1414_v44, %v808_v16  ;;  %vm825_vm14 = vweird.f32 %v1416_v10  ;;  %v1814_v36 = vpop.xlane.xlu2 %704  ;;  %v1828_v62 = vpop.xlane.xlu1 %710 }
 0x2b0   : > { %v790_v8 = vsel %vm787_vm5, %v789_v5, %v785_v4  ;;  %v799_v19 = vsel %vm798_vm8, %v1412_v40, %v795_v12  ;;  %v1418_v17 = vpop.eup %1417  ;;  %v1034_v39 = vpop.f32.mrf.mxu3  ;;  %vm826_vm0 = vmor %vm824_vm15, %vm825_vm14  ;;  %1421 = vrcp.f32 %v1814_v36  ;;  %vm829_vm1 = vcmp.eq.f32.partialorder %v828_v45, 8.507059e+37 }
 0x2b1   : > { %v1062_v13 = vmul.f32 %v1022_v37, %v790_v8  ;;  %v821_v23 = vsub.f32 1.0, %v820_v18  ;;  %v804_v24 = vsel %vm801_vm9, %v803_v20, %v799_v19  ;;  %v813_v29 = vsel %vm812_vm12, %v1414_v44, %v809_v22 }
 0x2b2   : > { %v1063_v27 = vmul.f32 %v1025_v56, %v804_v24  ;;  %v834_v32 = vmul.f32 %v1418_v17, %v1800_v11  ;;  %v818_v34 = vsel %vm815_vm13, %v817_v31, %v813_v29  ;;  %v830_v37 = vand.u32 2147483648, %v1792_v42  ;;  %v1420_v46 = vpop.eup %1419 }
 0x2b3   : > { %1076 = vxpose.xlu2.b32.cont [3/16] (narrow) %v1060_v54, 24  ;;  %v822_v30 = vmul.f32 %v1416_v10, %v821_v23  ;;  %v1064_v43 = vmul.f32 %v1028_v6, %v818_v34  ;;  %v848_v38 = vmul.f32 %v1420_v46, %v1808_v26  ;;  %vm839_vm2 = vweird.f32 %v1418_v17 }
 0x2b4   : > { %v835_v41 = vsub.f32 1.0, %v834_v32  ;;  %v831_v48 = vor.u32 1.1754944e-38, %v830_v37  ;;  %1423 = vrcp.f32 %v1821_v52  ;;  %vm840_vm4 = vmor %vm838_vm3, %vm839_vm2  ;;  %vm843_vm5 = vcmp.eq.f32.partialorder %v842_v57, 8.507059e+37 }
 0x2b5   : > { %v823_v35 = vadd.f32 %v1416_v10, %v822_v30  ;;  %v849_v51 = vsub.f32 1.0, %v848_v38  ;;  %vm853_vm6 = vweird.f32 %v1420_v46  ;;  %1425 = vrcp.f32 %v1828_v62 }
 0x2b6   : > { %v836_v33 = vmul.f32 %v1418_v17, %v835_v41  ;;  %v1422_v50 = vpop.eup %1421  ;;  %vm854_vm8 = vmor %vm852_vm7, %vm853_vm6  ;;  %vm857_vm9 = vcmp.eq.f32.partialorder %v856_v2, 8.507059e+37  ;;  %vm866_vm11 = vweird.f32 %v1814_v36  ;;  %v870_v14 = vand.u32 2147483647, %v1814_v36 }
 0x2b7   : > { %v827_v47 = vsel %vm826_vm0, %v1416_v10, %v823_v35  ;;  %v862_v56 = vmul.f32 %v1422_v50, %v1814_v36  ;;  %v850_v59 = vmul.f32 %v1420_v46, %v849_v51  ;;  %vm867_vm10 = vweird.f32 %v1422_v50  ;;  %v1836_v12 = vpop.xlane.xlu2 %713  ;;  %v1842_v24 = vpop.xlane.xlu0 %716 }
 0x2b8   : > { %v832_v49 = vsel %vm829_vm1, %v831_v48, %v827_v47  ;;  %v837_v54 = vadd.f32 %v1418_v17, %v836_v33  ;;  %v1037_v40 = vpop.f32.mrf.mxu3  ;;  %v872_v10 = vand.u32 2147483648, %v1814_v36  ;;  %vm868_vm12 = vmor %vm866_vm11, %vm867_vm10  ;;  %1427 = vrcp.f32 %v1836_v12 }
 0x2b9   : > { %v1065_v53 = vmul.f32 %v1031_v21, %v832_v49  ;;  %v863_v61 = vsub.f32 1.0, %v862_v56  ;;  %v851_v63 = vadd.f32 %v1420_v46, %v850_v59  ;;  %vm871_vm13 = vcmp.eq.f32.partialorder %v870_v14, 8.507059e+37 }
 0x2ba   : > { %v841_v58 = vsel %vm840_vm4, %v1418_v17, %v837_v54  ;;  %v1424_v0 = vpop.eup %1423  ;;  %v873_v18 = vor.u32 1.1754944e-38, %v872_v10  ;;  %v886_v28 = vand.u32 2147483648, %v1821_v52  ;;  %vm880_vm15 = vweird.f32 %v1821_v52 }
 0x2bb   : > { %1077 = vxpose.xlu2.b32.cont [4/16] (narrow) %v1061_v1, 24  ;;  %v846_v42 = vsel %vm843_vm5, %v845_v60, %v841_v58  ;;  %v858_v1 = vand.u32 2147483648, %v1808_v26  ;;  %v864_v3 = vmul.f32 %v1422_v50, %v863_v61  ;;  %v876_v5 = vmul.f32 %v1424_v0, %v1821_v52  ;;  %v1426_v15 = vpop.eup %1425 }
 0x2bc   : > { %v1066_v44 = vmul.f32 %v1034_v39, %v846_v42  ;;  %v855_v6 = vsel %vm854_vm8, %v1420_v46, %v851_v63  ;;  %v890_v19 = vmul.f32 %v1426_v15, %v1828_v62  ;;  %vm881_vm14 = vweird.f32 %v1424_v0 }
 0x2bd   : > { %v859_v7 = vor.u32 1.1754944e-38, %v858_v1  ;;  %v865_v8 = vadd.f32 %v1422_v50, %v864_v3  ;;  %v877_v11 = vsub.f32 1.0, %v876_v5  ;;  %v884_v17 = vand.u32 2147483647, %v1821_v52  ;;  %vm882_vm0 = vmor %vm880_vm15, %vm881_vm14 }
 0x2be   : > { %v891_v23 = vsub.f32 1.0, %v890_v19  ;;  %v1428_v26 = vpop.eup %1427  ;;  %1429 = vrcp.f32 %v1842_v24  ;;  %v887_v32 = vor.u32 1.1754944e-38, %v886_v28  ;;  %vm895_vm2 = vweird.f32 %v1426_v15 }
 0x2bf   : > { %v860_v9 = vsel %vm857_vm9, %v859_v7, %v855_v6  ;;  %v869_v16 = vsel %vm868_vm12, %v1422_v50, %v865_v8  ;;  %v878_v20 = vmul.f32 %v1424_v0, %v877_v11  ;;  %v904_v29 = vmul.f32 %v1428_v26, %v1836_v12  ;;  %v720_v37 = vpop.xlane.xlu1 %719 }
 0x2c0   : > { %v1040_v4 = vpop.f32.mrf.mxu3  ;;  %v874_v21 = vsel %vm871_vm13, %v873_v18, %v869_v16  ;;  %v892_v31 = vmul.f32 %v1426_v15, %v891_v23  ;;  %vm885_vm1 = vcmp.eq.f32.partialorder %v884_v17, 8.507059e+37  ;;  %v900_v45 = vand.u32 2147483648, %v1828_v62 }
 0x2c1   : > { %v1068_v25 = vmul.f32 %v1040_v4, %v874_v21  ;;  %v905_v36 = vsub.f32 1.0, %v904_v29  ;;  %vm894_vm3 = vweird.f32 %v1828_v62  ;;  %v898_v46 = vand.u32 2147483647, %v1828_v62 }
 0x2c2   : > { %v893_v41 = vadd.f32 %v1426_v15, %v892_v31  ;;  %1431 = vrcp.f32 %v720_v37  ;;  %vm896_vm4 = vmor %vm894_vm3, %vm895_vm2  ;;  %v901_v33 = vor.u32 1.1754944e-38, %v900_v45  ;;  %vm909_vm6 = vweird.f32 %v1428_v26 }
 0x2c3   : > { %1078 = vxpose.xlu2.b32.cont [5/16] (narrow) %v1062_v13, 24  ;;  %v1067_v13 = vmul.f32 %v1037_v40, %v860_v9  ;;  %v906_v38 = vmul.f32 %v1428_v26, %v905_v36  ;;  %vm899_vm5 = vcmp.eq.f32.partialorder %v898_v46, 8.507059e+37  ;;  %v914_v54 = vand.u32 2147483648, %v1836_v12 }
 0x2c4   : > { %v897_v48 = vsel %vm896_vm4, %v1426_v15, %v893_v41  ;;  %vm908_vm7 = vweird.f32 %v1836_v12  ;;  %v912_v40 = vand.u32 2147483647, %v1836_v12  ;;  %vm922_vm11 = vweird.f32 %v1842_v24 }
 0x2c5   : > { %v902_v49 = vsel %vm899_vm5, %v901_v33, %v897_v48  ;;  %v907_v52 = vadd.f32 %v1428_v26, %v906_v38  ;;  %vm910_vm8 = vmor %vm908_vm7, %vm909_vm6  ;;  %v915_v59 = vor.u32 1.1754944e-38, %v914_v54  ;;  %v926_v63 = vand.u32 2147483647, %v1842_v24 }
 0x2c6   : > { %vm913_vm9 = vcmp.eq.f32.partialorder %v912_v40, 8.507059e+37  ;;  %v942_v7 = vand.u32 2147483648, %v720_v37  ;;  %vm936_vm15 = vweird.f32 %v720_v37  ;;  %v940_v8 = vand.u32 2147483647, %v720_v37 }
 0x2c7   : > { %v911_v58 = vsel %vm910_vm8, %v1428_v26, %v907_v52  ;;  %vm927_vm13 = vcmp.eq.f32.partialorder %v926_v63, 8.507059e+37 }
 0x2c8   : > { %v1043_v22 = vpop.f32.mrf.mxu3  ;;  %v916_v60 = vsel %vm913_vm9, %v915_v59, %v911_v58  ;;  %v943_v10 = vor.u32 1.1754944e-38, %v942_v7 }
 0x2cb   : > { %1079 = vxpose.xlu2.b32.cont [6/16] (narrow) %v1063_v27, 24  ;;  %v879_v27 = vadd.f32 %v1424_v0, %v878_v20 }
 0x2cd   : > { %v883_v30 = vsel %vm882_vm0, %v1424_v0, %v879_v27 }
 0x2ce   : > { %v888_v34 = vsel %vm885_vm1, %v887_v32, %v883_v30  ;;  %vm941_vm1 = vcmp.eq.f32.partialorder %v940_v8, 8.507059e+37 }
 0x2cf   : > { %v1069_v39 = vmul.f32 %v1043_v22, %v888_v34 }
 0x2d0   : > { %v1046_v35 = vpop.f32.mrf.mxu3 }
 0x2d1   : > { %v1070_v51 = vmul.f32 %v1046_v35, %v902_v49 }
 0x2d3   : > { %1080 = vxpose.xlu2.b32.cont [7/16] (narrow) %v1064_v43, 24  ;;  %v1430_v43 = vpop.eup %1429 }
 0x2d4   : > { %v918_v47 = vmul.f32 %v1430_v43, %v1842_v24  ;;  %vm923_vm10 = vweird.f32 %v1430_v43 }
 0x2d5   : > { %vm924_vm12 = vmor %vm922_vm11, %vm923_vm10 }
 0x2d6   : > { %v919_v50 = vsub.f32 1.0, %v918_v47 }
 0x2d8   : > { %v1049_v55 = vpop.f32.mrf.mxu3  ;;  %v920_v56 = vmul.f32 %v1430_v43, %v919_v50 }
 0x2d9   : > { %v1071_v42 = vmul.f32 %v1049_v55, %v916_v60 }
 0x2da   : > { %v921_v62 = vadd.f32 %v1430_v43, %v920_v56 }
 0x2db   : > { %1081 = vxpose.xlu2.b32.cont [8/16] (narrow) %v1065_v53, 24  ;;  %v1432_v53 = vpop.eup %1431 }
 0x2dc   : > { %v932_v57 = vmul.f32 %v1432_v53, %v720_v37  ;;  %v925_v2 = vsel %vm924_vm12, %v1430_v43, %v921_v62  ;;  %vm937_vm14 = vweird.f32 %v1432_v53 }
 0x2dd   : > { %vm938_vm0 = vmor %vm936_vm15, %vm937_vm14 }
 0x2de   : > { %v933_v61 = vsub.f32 1.0, %v932_v57 }
 0x2e0   : > { %v1052_v0 = vpop.f32.mrf.mxu3  ;;  %v934_v1 = vmul.f32 %v1432_v53, %v933_v61 }
 0x2e2   : > { %v935_v6 = vadd.f32 %v1432_v53, %v934_v1 }
 0x2e3   : > { %1082 = vxpose.xlu2.b32.cont [9/16] (narrow) %v1066_v44, 24  ;;  %v928_v44 = vand.u32 2147483648, %v1842_v24 }
 0x2e4   : > { %v939_v9 = vsel %vm938_vm0, %v1432_v53, %v935_v6 }
 0x2e5   : > { %v929_v3 = vor.u32 1.1754944e-38, %v928_v44  ;;  %v944_v12 = vsel %vm941_vm1, %v943_v10, %v939_v9 }
 0x2e7   : > { %v930_v4 = vsel %vm927_vm13, %v929_v3, %v925_v2 }
 0x2e8   : > { %v1072_v5 = vmul.f32 %v1052_v0, %v930_v4  ;;  %v1055_v11 = vpop.f32.mrf.mxu3 }
 0x2eb   : > { %1083 = vxpose.xlu2.b32.cont [10/16] (narrow) %v1067_v13, 24  ;;  %v1073_v13 = vmul.f32 %v1055_v11, %v944_v12 }
 0x2f3   : > { %1084 = vxpose.xlu2.b32.cont [11/16] (narrow) %v1068_v25, 24 }
 0x2fb   : > { %1085 = vxpose.xlu2.b32.cont [12/16] (narrow) %v1069_v39, 24 }
 0x303   : > { %1086 = vxpose.xlu2.b32.cont [13/16] (narrow) %v1070_v51, 24 }
 0x30b   : > { %1087 = vxpose.xlu2.b32.cont [14/16] (narrow) %v1071_v42, 24 }
 0x313   : > { %1088 = vxpose.xlu2.b32.cont [15/16] (narrow) %v1072_v5, 24 }
 0x31b   : > { %1089 = vxpose.xlu2.b32.end [16/16] (narrow) %v1073_v13, 24 }
 0x33c   : > { %v1090_v14 = vpop.trf.xlu2 }
 0x344   : > { %v1091_v15 = vpop.trf.xlu2 }
 0x345   : > { %1106 = vst [vmem:[%s280_s13] sm:$0xff] %v1091_v15 }
 0x349   : > { %1114 = sbr.rel (!%p1570_p5) target bundleno = 854 (0x356), region = 48 }
 0x34c   : > { %v1092_v16 = vpop.trf.xlu2  ;;  %v1149_v18 = vld [vmem:[%s280_s13] sm:$0xff] (%p1570_p5) }
 0x34d   : > { %1107 = vst [vmem:[%s280_s13 + $0x8] sm:$0xff] %v1092_v16 }
 0x34e   : > { %1150 = vst [vmem:[%s1118_s21] sm:$0xff] %v1149_v18 }
 0x354   : > { %v1151_v19 = vld [vmem:[%s280_s13 + $0x8] sm:$0xff] }
 0x355   : > { %1152 = vst [vmem:[%s1118_s21 + $0x10] sm:$0xff] %v1151_v19 }
 0x356 PF: > { %s16_s27 = sadd.s32 1, %s1487_s27   ;;  %s1896_s21 = smov %s1467_s22 }
 0x357   : > { %p13_p11 = scmp.ge.s32.totalorder %s16_s27, 6   ;;  %s1897_s22 = smov %s1581_s12 }
 0x358   : > { %s1898_s23 = smov %s1479_s25  ;;  %s1899_s24 = smov %s1483_s26 }
 0x359   : > { %s1900_s25 = smov %s1903_s28  ;;  %s1901_s26 = smov %s1907_s29 }
 0x35a   :  { %15 = sbr.rel (!%p13_p11) target bundleno = 4 (0x4), region = 115 }

</bundles_post_ra>
